<compile_context>
chip_gen: v7x
topology: tpu7x:2x2x1
jax: 0.10.0
libtpu: 0.0.40
codegen_flags: <defaults>
</compile_context>

<pallas_src>
import jax
import jax.numpy as jnp
from jax.experimental import pallas as pl
from jax.experimental.pallas import tpu as pltpu

EPS = 1e-5                                # PyTorch InstanceNorm2d default eps
_VMEM_STEP_BUDGET = 24 * 1024 * 1024      # per-grid-step estimate (safe for v7x 64 MiB)
_VMEM_LIMIT = 48 * 1024 * 1024


def _round_up(x, m):
    return (x + m - 1) // m * m


def _pick_row_tile(Ho, Wp, Cin, Coutp, in_bytes):
    """Largest output-row tile (multiple of 8) whose per-step VMEM estimate fits."""
    cap = max(8, _round_up(Ho, 8))
    best, th = 8, 8
    while th <= cap:
        parity_in = 4 * (th + 2) * Wp * Cin * in_bytes * 2   # 4 parity tiles, dbl-buffered
        y_out = th * Wp * Coutp * 4 * 2                      # f32 output tile, dbl-buffered
        temps = 2 * th * Wp * Coutp * 4                      # accumulator & temporaries
        weights = 9 * Cin * Coutp * in_bytes * 2
        if parity_in + y_out + temps + weights + (1 << 20) > _VMEM_STEP_BUDGET:
            break
        best = th
        th += 8
    return best


def conv_stride2_block(x_nchw, weight, bias, *, operand_dtype=jnp.bfloat16):
    """Conv2d(Cin,Cout,k=3,s=2,p=1,bias=True) -> InstanceNorm2d(affine=False) -> ReLU.

    x_nchw: (N, Cin, H, W), weight: (Cout, Cin, 3, 3), bias: (Cout,)
    returns: (N, Cout, ceil(H/2), ceil(W/2))
    """
    N, Cin, H, W = x_nchw.shape
    Cout = weight.shape[0]
    Ho = (H - 1) // 2 + 1
    Wo = (W - 1) // 2 + 1
    Wp = Wo + 1                                   # flat-layout output row stride (1 dummy col)
    Coutp = _round_up(Cout, 128)                  # lane-dense output channels

    Th = _pick_row_tile(Ho, Wp, Cin, Coutp, jnp.dtype(operand_dtype).itemsize)
    n_t = pl.cdiv(Ho, Th)                         # output-row tiles
    M = Th * Wp                                   # flat output rows per tile
    Lb = (Th + 2) * Wp                            # flat parity rows per tile (incl. halo)
    Hp_need = n_t * Th + 2                        # parity rows needed (halo + row padding)

    # ---------------- glue: pure layout transforms (~1x input bytes) ----------------
    x = jnp.transpose(x_nchw, (0, 2, 3, 1)).astype(operand_dtype)              # NHWC, bf16
    xp = jnp.pad(x, ((0, 0), (1, 2 * Hp_need - H - 1), (1, 2 * Wp - W - 1), (0, 0)))
    # overlapped (2-row halo) row tiles of each stride-2 parity grid, flattened
    tile_rows = jnp.arange(n_t)[:, None] * Th + jnp.arange(Th + 2)[None, :]    # (n_t, Th+2)
    parities = []
    for a in (0, 1):
        for b in (0, 1):
            p = xp[:, a::2, b::2, :]                       # (N, Hp_need, Wp, Cin)
            p = jnp.take(p, tile_rows, axis=1)             # (N, n_t, Th+2, Wp, Cin)
            parities.append(p.reshape(N, n_t, Lb, Cin))

    # per-tap weights (9, Cin, Coutp); bias (1, Coutp) in f32
    w_taps = jnp.transpose(weight, (2, 3, 1, 0)).reshape(9, Cin, Cout)
    w_taps = jnp.pad(w_taps, ((0, 0), (0, 0), (0, Coutp - Cout))).astype(operand_dtype)
    b_row = jnp.pad(bias.astype(jnp.float32), (0, Coutp - Cout)).reshape(1, Coutp)

    # validity mask of the flat (row-padded, Wp-wide) output layout
    valid = (jnp.arange(n_t * Th)[:, None] < Ho) & (jnp.arange(Wp)[None, :] < Wo)
    mask = valid.astype(jnp.float32).reshape(n_t, M, 1)

    inv_cnt = 1.0 / float(Ho * Wo)

    def _conv_bias(p00_ref, p01_ref, p10_ref, p11_ref, w_ref, b_ref):
        """9 accumulating tap matmuls on the MXU -> (M, Coutp) f32 conv + bias."""
        parity = ((p00_ref, p01_ref), (p10_ref, p11_ref))
        acc = jnp.zeros((M, Coutp), jnp.float32)
        for kh in range(3):
            for kw in range(3):
                pa, dh = kh % 2, kh // 2
                pb, dw = kw % 2, kw // 2
                off = dh * Wp + dw                                   # static flat tap offset
                x_tap = parity[pa][pb][pl.ds(off, M), :]             # (M, Cin) bf16
                acc = acc + jnp.dot(x_tap, w_ref[kh * 3 + kw],
                                    preferred_element_type=jnp.float32)
        return acc + b_ref[...]

    w_block = pl.BlockSpec((9, Cin, Coutp), lambda *_: (0, 0, 0))
    b_block = pl.BlockSpec((1, Coutp), lambda *_: (0, 0))

    if n_t == 1:
        # -------- fused single pass: conv + bias + instance-norm + ReLU, grid=(N,) --------
        def fused_kernel(p00_ref, p01_ref, p10_ref, p11_ref,
                         w_ref, b_ref, mask_ref, o_ref):
            y = _conv_bias(p00_ref, p01_ref, p10_ref, p11_ref, w_ref, b_ref)
            m = mask_ref[...]                                        # (M, 1) 0/1
            yv = y * m
            mean = jnp.sum(yv, axis=0, keepdims=True) * inv_cnt
            var = jnp.maximum(jnp.sum(yv * y, axis=0, keepdims=True) * inv_cnt
                              - mean * mean, 0.0)
            inv = jax.lax.rsqrt(var + EPS)
            o_ref[...] = jnp.maximum((y - mean) * inv, 0.0).astype(o_ref.dtype)

        par_spec = pl.BlockSpec((None, None, Lb, Cin), lambda n: (n, 0, 0, 0))
        out = pl.pallas_call(
            fused_kernel,
            out_shape=jax.ShapeDtypeStruct((N, M, Coutp), jnp.float32),
            grid=(N,),
            in_specs=[
                par_spec, par_spec, par_spec, par_spec,
                w_block, b_block,
                pl.BlockSpec((None, M, 1), lambda n: (0, 0, 0)),
            ],
            out_specs=pl.BlockSpec((None, M, Coutp), lambda n: (n, 0, 0)),
            compiler_params=pltpu.CompilerParams(
                dimension_semantics=("parallel",),
                vmem_limit_bytes=_VMEM_LIMIT),
        )(*parities, w_taps, b_row, mask)
    else:
        # -------- pass A: conv + bias + per-tile masked partial moments --------
        def conv_tap_kernel(p00_ref, p01_ref, p10_ref, p11_ref,
                            w_ref, b_ref, mask_ref, y_ref, mom_ref):
            y = _conv_bias(p00_ref, p01_ref, p10_ref, p11_ref, w_ref, b_ref)
            y_ref[...] = y
            yv = y * mask_ref[...]                                   # exclude dummy col / pad rows
            s1 = jnp.sum(yv, axis=0, keepdims=True)                  # (1, Coutp)
            s2 = jnp.sum(yv * y, axis=0, keepdims=True)              # (1, Coutp)
            mom_ref[...] = jnp.concatenate([s1, s2], axis=0)

        par_spec = pl.BlockSpec((None, None, Lb, Cin), lambda n, t: (n, t, 0, 0))
        y, mom = pl.pallas_call(
            conv_tap_kernel,
            out_shape=(
                jax.ShapeDtypeStruct((N, n_t * M, Coutp), jnp.float32),
                jax.ShapeDtypeStruct((N, n_t, 2, Coutp), jnp.float32),
            ),
            grid=(N, n_t),
            in_specs=[
                par_spec, par_spec, par_spec, par_spec,
                w_block, b_block,
                pl.BlockSpec((None, M, 1), lambda n, t: (t, 0, 0)),
            ],
            out_specs=(
                pl.BlockSpec((None, M, Coutp), lambda n, t: (n, t, 0)),
                pl.BlockSpec((None, None, 2, Coutp), lambda n, t: (n, t, 0, 0)),
            ),
            compiler_params=pltpu.CompilerParams(
                dimension_semantics=("parallel", "parallel"),
                vmem_limit_bytes=_VMEM_LIMIT),
        )(*parities, w_taps, b_row, mask)

        # -------- pass B: reduce moments + normalize + ReLU --------
        def norm_relu_kernel(y_ref, mom_ref, o_ref):
            s = jnp.sum(mom_ref[...], axis=0)                        # (2, Coutp) cross-tile sum
            mean = s[0:1, :] * inv_cnt
            var = jnp.maximum(s[1:2, :] * inv_cnt - mean * mean, 0.0)
            inv = jax.lax.rsqrt(var + EPS)
            o_ref[...] = jnp.maximum((y_ref[...] - mean) * inv, 0.0).astype(o_ref.dtype)

        out = pl.pallas_call(
            norm_relu_kernel,
            out_shape=jax.ShapeDtypeStruct((N, n_t * M, Coutp), jnp.float32),
            grid=(N, n_t),
            in_specs=[
                pl.BlockSpec((None, M, Coutp), lambda n, t: (n, t, 0)),
                pl.BlockSpec((None, n_t, 2, Coutp), lambda n, t: (n, 0, 0, 0)),
            ],
            out_specs=pl.BlockSpec((None, M, Coutp), lambda n, t: (n, t, 0)),
            compiler_params=pltpu.CompilerParams(
                dimension_semantics=("parallel", "parallel"),
                vmem_limit_bytes=_VMEM_LIMIT),
        )(y, mom)

    out = out.reshape(N, n_t * Th, Wp, Coutp)[:, :Ho, :Wo, :Cout]
    return jnp.transpose(out, (0, 3, 1, 2)).astype(x_nchw.dtype)


def reference(x_nchw, weight, bias, operand_dtype=jnp.bfloat16):
    # Same operand rounding as the kernel (bf16 MXU operands, f32 accumulation / norm).
    xc = x_nchw.astype(operand_dtype).astype(jnp.float32)
    wc = weight.astype(operand_dtype).astype(jnp.float32)
    y = jax.lax.conv_general_dilated(
        xc, wc, window_strides=(2, 2), padding=((1, 1), (1, 1)),
        dimension_numbers=("NCHW", "OIHW", "NCHW"),
        preferred_element_type=jnp.float32)
    y = y + bias[None, :, None, None].astype(jnp.float32)
    mean = jnp.mean(y, axis=(2, 3), keepdims=True)
    var = jnp.mean(jnp.square(y - mean), axis=(2, 3), keepdims=True)
    y = (y - mean) * jax.lax.rsqrt(var + EPS)
    return jnp.maximum(y, 0.0).astype(x_nchw.dtype)


if __name__ == "__main__":
    key = jax.random.PRNGKey(0)
    k1, k2, k3 = jax.random.split(key, 3)
    N, Cin, H, W, Cout = 2, 4, 16, 16, 8
    x = jax.random.normal(k1, (N, Cin, H, W), jnp.float32)
    # deterministic synthetic params (norm='instance' => conv bias is used)
    weight = jax.random.normal(k2, (Cout, Cin, 3, 3), jnp.float32) * 0.1
    bias = jax.random.normal(k3, (Cout,), jnp.float32) * 0.1

    out = jax.block_until_ready(jax.jit(conv_stride2_block)(x, weight, bias))

    ref = reference(x, weight, bias)
    assert out.shape == (N, Cout, H // 2, W // 2), out.shape
    assert jnp.allclose(out, ref, rtol=5e-3, atol=5e-3), float(jnp.max(jnp.abs(out - ref)))
    print("KERNEL_OK")
</pallas_src>

<mosaic_0001>
module attributes {stable_mosaic.version = 11 : i64} {
  func.func @fused_kernel(%arg0: i32, %arg1: memref<1x1x90x4xbf16, #tpu.memory_space<vmem>>, %arg2: memref<1x1x90x4xbf16, #tpu.memory_space<vmem>>, %arg3: memref<1x1x90x4xbf16, #tpu.memory_space<vmem>>, %arg4: memref<1x1x90x4xbf16, #tpu.memory_space<vmem>>, %arg5: memref<9x4x128xbf16, #tpu.memory_space<vmem>>, %arg6: memref<1x128xf32, #tpu.memory_space<vmem>>, %arg7: memref<1x72x1xf32, #tpu.memory_space<vmem>>, %arg8: memref<1x72x128xf32, #tpu.memory_space<vmem>>) attributes {dimension_semantics = [#tpu.dimension_semantics<parallel>], iteration_bounds = array<i64: 2>, scalar_prefetch = 0 : i64, scratch_operands = 0 : i64, tpu.core_type = #tpu.core_type<tc>, window_params = [{transform_indices = @transform_0, window_bounds = array<i64: 1, 1, 90, 4>}, {transform_indices = @transform_1, window_bounds = array<i64: 1, 1, 90, 4>}, {transform_indices = @transform_2, window_bounds = array<i64: 1, 1, 90, 4>}, {transform_indices = @transform_3, window_bounds = array<i64: 1, 1, 90, 4>}, {pipeline_mode = #tpu.pipeline_mode<synchronous>, transform_indices = @transform_4, window_bounds = array<i64: 9, 4, 128>}, {pipeline_mode = #tpu.pipeline_mode<synchronous>, transform_indices = @transform_5, window_bounds = array<i64: 1, 128>}, {pipeline_mode = #tpu.pipeline_mode<synchronous>, transform_indices = @transform_6, window_bounds = array<i64: 1, 72, 1>}, {transform_indices = @transform_7, window_bounds = array<i64: 1, 72, 128>}]} {
    %cst = arith.constant 0.000000e+00 : f32
    %0 = vector.broadcast %cst : f32 to vector<72x128xf32>
    %c0 = arith.constant 0 : index
    %c0_0 = arith.constant 0 : index
    %c0_1 = arith.constant 0 : index
    %c0_2 = arith.constant 0 : index
    %1 = vector.load %arg1[%c0, %c0_0, %c0_1, %c0_2] : memref<1x1x90x4xbf16, #tpu.memory_space<vmem>>, vector<1x1x72x4xbf16>
    %2 = vector.shape_cast %1 : vector<1x1x72x4xbf16> to vector<72x4xbf16>
    %c0_3 = arith.constant 0 : index
    %c0_4 = arith.constant 0 : index
    %c0_5 = arith.constant 0 : index
    %3 = vector.load %arg5[%c0_3, %c0_4, %c0_5] : memref<9x4x128xbf16, #tpu.memory_space<vmem>>, vector<1x4x128xbf16>
    %4 = vector.shape_cast %3 : vector<1x4x128xbf16> to vector<4x128xbf16>
    %cst_6 = arith.constant dense<0.000000e+00> : vector<72x128xf32>
    %5 = tpu.matmul %2, %4, %cst_6 {dimension_numbers = #tpu.dot_dimension_numbers<[1], [0], [0], [1], [0, 0, 1, 1], [], []>} : vector<72x4xbf16>, vector<4x128xbf16>, vector<72x128xf32> -> vector<72x128xf32>
    %6 = arith.addf %0, %5 : vector<72x128xf32>
    %c0_7 = arith.constant 0 : index
    %c0_8 = arith.constant 0 : index
    %c0_9 = arith.constant 0 : index
    %c0_10 = arith.constant 0 : index
    %7 = vector.load %arg2[%c0_7, %c0_8, %c0_9, %c0_10] : memref<1x1x90x4xbf16, #tpu.memory_space<vmem>>, vector<1x1x72x4xbf16>
    %8 = vector.shape_cast %7 : vector<1x1x72x4xbf16> to vector<72x4xbf16>
    %c1 = arith.constant 1 : index
    %c0_11 = arith.constant 0 : index
    %c0_12 = arith.constant 0 : index
    %9 = vector.load %arg5[%c1, %c0_11, %c0_12] : memref<9x4x128xbf16, #tpu.memory_space<vmem>>, vector<1x4x128xbf16>
    %10 = vector.shape_cast %9 : vector<1x4x128xbf16> to vector<4x128xbf16>
    %cst_13 = arith.constant dense<0.000000e+00> : vector<72x128xf32>
    %11 = tpu.matmul %8, %10, %cst_13 {dimension_numbers = #tpu.dot_dimension_numbers<[1], [0], [0], [1], [0, 0, 1, 1], [], []>} : vector<72x4xbf16>, vector<4x128xbf16>, vector<72x128xf32> -> vector<72x128xf32>
    %12 = arith.addf %6, %11 : vector<72x128xf32>
    %c0_14 = arith.constant 0 : index
    %c0_15 = arith.constant 0 : index
    %c1_16 = arith.constant 1 : index
    %c0_17 = arith.constant 0 : index
    %13 = vector.load %arg1[%c0_14, %c0_15, %c1_16, %c0_17] : memref<1x1x90x4xbf16, #tpu.memory_space<vmem>>, vector<1x1x72x4xbf16>
    %14 = vector.shape_cast %13 : vector<1x1x72x4xbf16> to vector<72x4xbf16>
    %c2 = arith.constant 2 : index
    %c0_18 = arith.constant 0 : index
    %c0_19 = arith.constant 0 : index
    %15 = vector.load %arg5[%c2, %c0_18, %c0_19] : memref<9x4x128xbf16, #tpu.memory_space<vmem>>, vector<1x4x128xbf16>
    %16 = vector.shape_cast %15 : vector<1x4x128xbf16> to vector<4x128xbf16>
    %cst_20 = arith.constant dense<0.000000e+00> : vector<72x128xf32>
    %17 = tpu.matmul %14, %16, %cst_20 {dimension_numbers = #tpu.dot_dimension_numbers<[1], [0], [0], [1], [0, 0, 1, 1], [], []>} : vector<72x4xbf16>, vector<4x128xbf16>, vector<72x128xf32> -> vector<72x128xf32>
    %18 = arith.addf %12, %17 : vector<72x128xf32>
    %c0_21 = arith.constant 0 : index
    %c0_22 = arith.constant 0 : index
    %c0_23 = arith.constant 0 : index
    %c0_24 = arith.constant 0 : index
    %19 = vector.load %arg3[%c0_21, %c0_22, %c0_23, %c0_24] : memref<1x1x90x4xbf16, #tpu.memory_space<vmem>>, vector<1x1x72x4xbf16>
    %20 = vector.shape_cast %19 : vector<1x1x72x4xbf16> to vector<72x4xbf16>
    %c3 = arith.constant 3 : index
    %c0_25 = arith.constant 0 : index
    %c0_26 = arith.constant 0 : index
    %21 = vector.load %arg5[%c3, %c0_25, %c0_26] : memref<9x4x128xbf16, #tpu.memory_space<vmem>>, vector<1x4x128xbf16>
    %22 = vector.shape_cast %21 : vector<1x4x128xbf16> to vector<4x128xbf16>
    %cst_27 = arith.constant dense<0.000000e+00> : vector<72x128xf32>
    %23 = tpu.matmul %20, %22, %cst_27 {dimension_numbers = #tpu.dot_dimension_numbers<[1], [0], [0], [1], [0, 0, 1, 1], [], []>} : vector<72x4xbf16>, vector<4x128xbf16>, vector<72x128xf32> -> vector<72x128xf32>
    %24 = arith.addf %18, %23 : vector<72x128xf32>
    %c0_28 = arith.constant 0 : index
    %c0_29 = arith.constant 0 : index
    %c0_30 = arith.constant 0 : index
    %c0_31 = arith.constant 0 : index
    %25 = vector.load %arg4[%c0_28, %c0_29, %c0_30, %c0_31] : memref<1x1x90x4xbf16, #tpu.memory_space<vmem>>, vector<1x1x72x4xbf16>
    %26 = vector.shape_cast %25 : vector<1x1x72x4xbf16> to vector<72x4xbf16>
    %c4 = arith.constant 4 : index
    %c0_32 = arith.constant 0 : index
    %c0_33 = arith.constant 0 : index
    %27 = vector.load %arg5[%c4, %c0_32, %c0_33] : memref<9x4x128xbf16, #tpu.memory_space<vmem>>, vector<1x4x128xbf16>
    %28 = vector.shape_cast %27 : vector<1x4x128xbf16> to vector<4x128xbf16>
    %cst_34 = arith.constant dense<0.000000e+00> : vector<72x128xf32>
    %29 = tpu.matmul %26, %28, %cst_34 {dimension_numbers = #tpu.dot_dimension_numbers<[1], [0], [0], [1], [0, 0, 1, 1], [], []>} : vector<72x4xbf16>, vector<4x128xbf16>, vector<72x128xf32> -> vector<72x128xf32>
    %30 = arith.addf %24, %29 : vector<72x128xf32>
    %c0_35 = arith.constant 0 : index
    %c0_36 = arith.constant 0 : index
    %c1_37 = arith.constant 1 : index
    %c0_38 = arith.constant 0 : index
    %31 = vector.load %arg3[%c0_35, %c0_36, %c1_37, %c0_38] : memref<1x1x90x4xbf16, #tpu.memory_space<vmem>>, vector<1x1x72x4xbf16>
    %32 = vector.shape_cast %31 : vector<1x1x72x4xbf16> to vector<72x4xbf16>
    %c5 = arith.constant 5 : index
    %c0_39 = arith.constant 0 : index
    %c0_40 = arith.constant 0 : index
    %33 = vector.load %arg5[%c5, %c0_39, %c0_40] : memref<9x4x128xbf16, #tpu.memory_space<vmem>>, vector<1x4x128xbf16>
    %34 = vector.shape_cast %33 : vector<1x4x128xbf16> to vector<4x128xbf16>
    %cst_41 = arith.constant dense<0.000000e+00> : vector<72x128xf32>
    %35 = tpu.matmul %32, %34, %cst_41 {dimension_numbers = #tpu.dot_dimension_numbers<[1], [0], [0], [1], [0, 0, 1, 1], [], []>} : vector<72x4xbf16>, vector<4x128xbf16>, vector<72x128xf32> -> vector<72x128xf32>
    %36 = arith.addf %30, %35 : vector<72x128xf32>
    %c0_42 = arith.constant 0 : index
    %c0_43 = arith.constant 0 : index
    %c9 = arith.constant 9 : index
    %c0_44 = arith.constant 0 : index
    %37 = vector.load %arg1[%c0_42, %c0_43, %c9, %c0_44] : memref<1x1x90x4xbf16, #tpu.memory_space<vmem>>, vector<1x1x72x4xbf16>
    %38 = vector.shape_cast %37 : vector<1x1x72x4xbf16> to vector<72x4xbf16>
    %c6 = arith.constant 6 : index
    %c0_45 = arith.constant 0 : index
    %c0_46 = arith.constant 0 : index
    %39 = vector.load %arg5[%c6, %c0_45, %c0_46] : memref<9x4x128xbf16, #tpu.memory_space<vmem>>, vector<1x4x128xbf16>
    %40 = vector.shape_cast %39 : vector<1x4x128xbf16> to vector<4x128xbf16>
    %cst_47 = arith.constant dense<0.000000e+00> : vector<72x128xf32>
    %41 = tpu.matmul %38, %40, %cst_47 {dimension_numbers = #tpu.dot_dimension_numbers<[1], [0], [0], [1], [0, 0, 1, 1], [], []>} : vector<72x4xbf16>, vector<4x128xbf16>, vector<72x128xf32> -> vector<72x128xf32>
    %42 = arith.addf %36, %41 : vector<72x128xf32>
    %c0_48 = arith.constant 0 : index
    %c0_49 = arith.constant 0 : index
    %c9_50 = arith.constant 9 : index
    %c0_51 = arith.constant 0 : index
    %43 = vector.load %arg2[%c0_48, %c0_49, %c9_50, %c0_51] : memref<1x1x90x4xbf16, #tpu.memory_space<vmem>>, vector<1x1x72x4xbf16>
    %44 = vector.shape_cast %43 : vector<1x1x72x4xbf16> to vector<72x4xbf16>
    %c7 = arith.constant 7 : index
    %c0_52 = arith.constant 0 : index
    %c0_53 = arith.constant 0 : index
    %45 = vector.load %arg5[%c7, %c0_52, %c0_53] : memref<9x4x128xbf16, #tpu.memory_space<vmem>>, vector<1x4x128xbf16>
    %46 = vector.shape_cast %45 : vector<1x4x128xbf16> to vector<4x128xbf16>
    %cst_54 = arith.constant dense<0.000000e+00> : vector<72x128xf32>
    %47 = tpu.matmul %44, %46, %cst_54 {dimension_numbers = #tpu.dot_dimension_numbers<[1], [0], [0], [1], [0, 0, 1, 1], [], []>} : vector<72x4xbf16>, vector<4x128xbf16>, vector<72x128xf32> -> vector<72x128xf32>
    %48 = arith.addf %42, %47 : vector<72x128xf32>
    %c0_55 = arith.constant 0 : index
    %c0_56 = arith.constant 0 : index
    %c10 = arith.constant 10 : index
    %c0_57 = arith.constant 0 : index
    %49 = vector.load %arg1[%c0_55, %c0_56, %c10, %c0_57] : memref<1x1x90x4xbf16, #tpu.memory_space<vmem>>, vector<1x1x72x4xbf16>
    %50 = vector.shape_cast %49 : vector<1x1x72x4xbf16> to vector<72x4xbf16>
    %c8 = arith.constant 8 : index
    %c0_58 = arith.constant 0 : index
    %c0_59 = arith.constant 0 : index
    %51 = vector.load %arg5[%c8, %c0_58, %c0_59] : memref<9x4x128xbf16, #tpu.memory_space<vmem>>, vector<1x4x128xbf16>
    %52 = vector.shape_cast %51 : vector<1x4x128xbf16> to vector<4x128xbf16>
    %cst_60 = arith.constant dense<0.000000e+00> : vector<72x128xf32>
    %53 = tpu.matmul %50, %52, %cst_60 {dimension_numbers = #tpu.dot_dimension_numbers<[1], [0], [0], [1], [0, 0, 1, 1], [], []>} : vector<72x4xbf16>, vector<4x128xbf16>, vector<72x128xf32> -> vector<72x128xf32>
    %54 = arith.addf %48, %53 : vector<72x128xf32>
    %c0_61 = arith.constant 0 : index
    %c0_62 = arith.constant 0 : index
    %55 = vector.load %arg6[%c0_61, %c0_62] : memref<1x128xf32, #tpu.memory_space<vmem>>, vector<1x128xf32>
    %56 = vector.broadcast %55 : vector<1x128xf32> to vector<72x128xf32>
    %57 = arith.addf %54, %56 : vector<72x128xf32>
    %c0_63 = arith.constant 0 : index
    %c0_64 = arith.constant 0 : index
    %c0_65 = arith.constant 0 : index
    %58 = vector.load %arg7[%c0_63, %c0_64, %c0_65] : memref<1x72x1xf32, #tpu.memory_space<vmem>>, vector<1x72x1xf32>
    %59 = vector.shape_cast %58 : vector<1x72x1xf32> to vector<72x1xf32>
    %60 = vector.broadcast %59 : vector<72x1xf32> to vector<72x128xf32>
    %61 = arith.mulf %57, %60 : vector<72x128xf32>
    %cst_66 = arith.constant dense<0.000000e+00> : vector<128xf32>
    %62 = vector.multi_reduction <add>, %61, %cst_66 [0] : vector<72x128xf32> to vector<128xf32>
    %63 = vector.shape_cast %62 : vector<128xf32> to vector<1x128xf32>
    %cst_67 = arith.constant 1.562500e-02 : f32
    %64 = vector.broadcast %cst_67 : f32 to vector<1x128xf32>
    %65 = arith.mulf %63, %64 : vector<1x128xf32>
    %66 = arith.mulf %61, %57 : vector<72x128xf32>
    %cst_68 = arith.constant dense<0.000000e+00> : vector<128xf32>
    %67 = vector.multi_reduction <add>, %66, %cst_68 [0] : vector<72x128xf32> to vector<128xf32>
    %68 = vector.shape_cast %67 : vector<128xf32> to vector<1x128xf32>
    %cst_69 = arith.constant 1.562500e-02 : f32
    %69 = vector.broadcast %cst_69 : f32 to vector<1x128xf32>
    %70 = arith.mulf %68, %69 : vector<1x128xf32>
    %71 = arith.mulf %65, %65 : vector<1x128xf32>
    %72 = arith.subf %70, %71 : vector<1x128xf32>
    %cst_70 = arith.constant 0.000000e+00 : f32
    %73 = vector.broadcast %cst_70 : f32 to vector<1x128xf32>
    %74 = arith.maximumf %72, %73 : vector<1x128xf32>
    %cst_71 = arith.constant 9.99999974E-6 : f32
    %75 = vector.broadcast %cst_71 : f32 to vector<1x128xf32>
    %76 = arith.addf %74, %75 : vector<1x128xf32>
    %77 = math.rsqrt %76 : vector<1x128xf32>
    %78 = vector.broadcast %65 : vector<1x128xf32> to vector<72x128xf32>
    %79 = arith.subf %57, %78 : vector<72x128xf32>
    %80 = vector.broadcast %77 : vector<1x128xf32> to vector<72x128xf32>
    %81 = arith.mulf %79, %80 : vector<72x128xf32>
    %cst_72 = arith.constant 0.000000e+00 : f32
    %82 = vector.broadcast %cst_72 : f32 to vector<72x128xf32>
    %83 = arith.maximumf %81, %82 : vector<72x128xf32>
    %c0_73 = arith.constant 0 : index
    %c0_74 = arith.constant 0 : index
    %c0_75 = arith.constant 0 : index
    %84 = vector.load %arg8[%c0_73, %c0_74, %c0_75] : memref<1x72x128xf32, #tpu.memory_space<vmem>>, vector<1x72x128xf32>
    %85 = vector.shape_cast %84 : vector<1x72x128xf32> to vector<72x128xf32>
    %86 = vector.shape_cast %83 : vector<72x128xf32> to vector<1x72x128xf32>
    tpu.vector_store %arg8[%c0_73, %c0_74, %c0_75], %86 {strides = array<i32>} : memref<1x72x128xf32, #tpu.memory_space<vmem>>, vector<1x72x128xf32>,
    return
  }
  func.func @transform_0(%arg0: i32) -> (i32, i32, i32, i32) {
    %c0_i32 = arith.constant 0 : i32
    %c0_i32_0 = arith.constant 0 : i32
    %c0_i32_1 = arith.constant 0 : i32
    %c0_i32_2 = arith.constant 0 : i32
    return %arg0, %c0_i32, %c0_i32_0, %c0_i32_1 : i32, i32, i32, i32
  }
  func.func @transform_1(%arg0: i32) -> (i32, i32, i32, i32) {
    %c0_i32 = arith.constant 0 : i32
    %c0_i32_0 = arith.constant 0 : i32
    %c0_i32_1 = arith.constant 0 : i32
    %c0_i32_2 = arith.constant 0 : i32
    return %arg0, %c0_i32, %c0_i32_0, %c0_i32_1 : i32, i32, i32, i32
  }
  func.func @transform_2(%arg0: i32) -> (i32, i32, i32, i32) {
    %c0_i32 = arith.constant 0 : i32
    %c0_i32_0 = arith.constant 0 : i32
    %c0_i32_1 = arith.constant 0 : i32
    %c0_i32_2 = arith.constant 0 : i32
    return %arg0, %c0_i32, %c0_i32_0, %c0_i32_1 : i32, i32, i32, i32
  }
  func.func @transform_3(%arg0: i32) -> (i32, i32, i32, i32) {
    %c0_i32 = arith.constant 0 : i32
    %c0_i32_0 = arith.constant 0 : i32
    %c0_i32_1 = arith.constant 0 : i32
    %c0_i32_2 = arith.constant 0 : i32
    return %arg0, %c0_i32, %c0_i32_0, %c0_i32_1 : i32, i32, i32, i32
  }
  func.func @transform_4(%arg0: i32) -> (i32, i32, i32) {
    %c0_i32 = arith.constant 0 : i32
    %c0_i32_0 = arith.constant 0 : i32
    %c0_i32_1 = arith.constant 0 : i32
    %c0_i32_2 = arith.constant 0 : i32
    return %c0_i32, %c0_i32_0, %c0_i32_1 : i32, i32, i32
  }
  func.func @transform_5(%arg0: i32) -> (i32, i32) {
    %c0_i32 = arith.constant 0 : i32
    %c0_i32_0 = arith.constant 0 : i32
    %c0_i32_1 = arith.constant 0 : i32
    return %c0_i32, %c0_i32_0 : i32, i32
  }
  func.func @transform_6(%arg0: i32) -> (i32, i32, i32) {
    %c0_i32 = arith.constant 0 : i32
    %c0_i32_0 = arith.constant 0 : i32
    %c0_i32_1 = arith.constant 0 : i32
    %c0_i32_2 = arith.constant 0 : i32
    return %c0_i32, %c0_i32_0, %c0_i32_1 : i32, i32, i32
  }
  func.func @transform_7(%arg0: i32) -> (i32, i32, i32) {
    %c0_i32 = arith.constant 0 : i32
    %c0_i32_0 = arith.constant 0 : i32
    %c0_i32_1 = arith.constant 0 : i32
    return %arg0, %c0_i32, %c0_i32_0 : i32, i32, i32
  }
}

</mosaic_0001>

<bundles_post_ra>
// kernel: conv_stride2_block.1
= control target key start
LH: loop header
LB: loop body
LE: loop exit
PB: predicated region body
PF: predicated region fallthrough
CT: control target
= control target key end

     0   :  { %s2391_s24 = smov 0   ;;  %s2861_s0 = inlined_call_operand.vmem [shape: bf16[2,1,90,4], index: 0, kind: input, shape index: {}]   ;;  %s2862_s1 = inlined_call_operand.vmem [shape: bf16[2,1,90,4], index: 1, kind: input, shape index: {}]   ;;  %s2863_s2 = inlined_call_operand.vmem [shape: bf16[2,1,90,4], index: 2, kind: input, shape index: {}]   ;;  %s2864_s3 = inlined_call_operand.vmem [shape: bf16[2,1,90,4], index: 3, kind: input, shape index: {}]   ;;  %s2865_s4 = inlined_call_operand.vmem [shape: bf16[9,4,128], index: 4, kind: input, shape index: {}]   ;;  %s2866_s5 = inlined_call_operand.vmem [shape: f32[1,128], index: 5, kind: input, shape index: {}]   ;;  %s2867_s6 = inlined_call_operand.vmem [shape: f32[1,72,1], index: 6, kind: input, shape index: {}]   ;;  %s2868_s7 = inlined_call_operand.vmem [shape: f32[2,72,128], index: 7, kind: output, shape index: {}]  }
   0x1 LB: > { %s1921_s25 = sadd.s32 4294967295, %s2346_s24   ;;  %p1925_p0 = scmp.ge.s32.totalorder %s2346_s24, 1  ;;  %s2346_s24 = sphi %s2391_s24, %s17_s24  }
   0x2   : > { %p267_p1 = scmp.lt.s32.totalorder %s2346_s24, 3 }
   0x4   : > { %p268_p2 = pnand %p1925_p0, %p267_p1 }
   0x5   : > { %v1931_v0 = vld [vmem:[%s2865_s4 + $0x2] sm:$0x3] (!%p268_p2)  ;;  %vm400_vm0 = vcmask (!%p268_p2), 1041408   ;;  %p314_p3 = scmp.lt.s32.totalorder (!%p268_p2), %s1921_s25, 1  ;;  %v2348_v1 = vmov (!%p268_p2), 0.0   ;;  %vm2349_vm1 = vmmov (!%p268_p2), 0  }
   0x6   : > { %271 = sbr.rel (%p268_p2) target bundleno = 456 (0x1c8), region = 48  ;;  %2082 = vmatprep.subr.bf16.mxu0 (!%p268_p2), %v2348_v1  ;;  %2280 = vmatprep.subr.bf16.mxu1 (!%p268_p2), %v2348_v1  ;;  %v402_v2 = vsel (!%p268_p2), %vm400_vm0, %v1931_v0, 0  ;;  %v1952_v3 = vld [vmem:[%s2865_s4 + $0x4] sm:$0x3] (!%p268_p2)  ;;  %v349_v4 = vld [vmem:[%s2865_s4] sm:$0x3] (!%p268_p2) }
   0x7   : > { %2083 = vmatpush3.bf16.msra.mxu0 (!%p268_p2), %v402_v2  ;;  %2281 = vmatpush3.bf16.msra.mxu1 (!%p268_p2), %v402_v2  ;;  %vm384_vm2 = vcmask (!%p268_p2), 31744   ;;  %v682_v6 = vsel (!%p268_p2), %vm400_vm0, %v1952_v3, 0  ;;  %v515_v8 = vsel (!%p268_p2), %vm400_vm0, %v349_v4, 0  ;;  %v1963_v15 = vld [vmem:[%s2865_s4 + $0x6] sm:$0x3] (!%p268_p2)  ;;  %vm1562_vm4 = vcmask (!%p268_p2), 1046528  }
   0x8   : > { %2084 = vmatprep.mubr.msk.bf16.mxu0 (!%p268_p2), %vm2349_vm1, %v2348_v1  ;;  %2096 = vmatprep.mubr.msk.bf16.mxu1 (!%p268_p2), %vm2349_vm1, %v2348_v1  ;;  %v815_v20 = vsel (!%p268_p2), %vm400_vm0, %v1963_v15, 0  ;;  %vm626_vm3 = vsmask.f32 (!%p268_p2), 7424  ;;  %v1974_v25 = vld [vmem:[%s2865_s4 + $0x8] sm:$0x3] (!%p268_p2) }
   0x9   : > { %2126 = vmatprep.subr.bf16.mxu0 (!%p268_p2), %v2348_v1  ;;  %2104 = vmatprep.subr.bf16.mxu1 (!%p268_p2), %v2348_v1  ;;  %v948_v31 = vsel (!%p268_p2), %vm400_vm0, %v1974_v25, 0 }
   0xd   : > { %s2870_s25 = smov (!%p314_p3, %s1921_s25), 1 }
   0xe   : > { %s2413_s28 = smul.u32 48, %s2870_s25 }
  0x10   : > { %s2426_s12 = scalar_lea.vmem %s2862_s1, %s2413_s28  ;;  %s2437_s15 = scalar_lea.vmem %s2861_s0, %s2413_s28 }
  0x11   : > { %v2297_v5 = vld [vmem:[%s2426_s12] sm:$0xff]   ;;  %v2298_v7 = vld [vmem:[%s2426_s12 + $0x18] sm:$0xff]   ;;  %v2299_v9 = vld [vmem:[%s2426_s12 + $0x8] sm:$0xff]   ;;  %s2465_s20 = scalar_lea.vmem %s2863_s2, %s2413_s28  ;;  %s2475_s23 = scalar_lea.vmem %s2864_s3, %s2413_s28 }
  0x12   : > { %2085 = vmatmul.mubr.msk.bf16.vlgmr.msra.gmra.mrb[0].mxu0 %vm384_vm2, %v2297_v5  ;;  %2097 = vmatmul.mubr.msk.bf16.vlgmr.msra.gmra.mrb[0].mxu1 %vm384_vm2, %v2298_v7  ;;  %v2300_v10 = vld [vmem:[%s2426_s12 + $0x20] ss:$0 sps:$4 sm:$0xff]   ;;  %v2305_v12 = vld [vmem:[%s2437_s15 + $0x8] sm:$0xff]   ;;  %v2301_v14 = vld [vmem:[%s2426_s12 + $0x10] sm:$0xff]  }
  0x13   : > { %2127 = vmatpush3.bf16.msra.mxu0 %v682_v6  ;;  %2105 = vmatpush3.bf16.msra.mxu1 %v515_v8  ;;  %v2304_v11 = vld [vmem:[%s2437_s15] sm:$0xff]   ;;  %v635_v19 = vshll.u32 %v2305_v12, 16  ;;  %v2469_v21 = vld [vmem:[%s2437_s15 + $0x10] sm:$0xff]   ;;  %v2482_v24 = vld [vmem:[%s2437_s15 + $0x18] sm:$0xff]   ;;  %v639_v29 = vshrl.u32 %v2305_v12, 16 }
  0x14   : > { %2088 = vmatprep.mubr.msk.bf16.mxu0 %vm2349_vm1, %v2348_v1  ;;  %2100 = vmatprep.mubr.msk.bf16.mxu1 %vm2349_vm1, %v2348_v1  ;;  %v630_v13 = vshll.u32 %v2304_v11, 16  ;;  %v2302_v16 = vld [vmem:[%s2437_s15] sm:$0xff]   ;;  %v628_v17 = vshrl.u32 %v2304_v11, 16  ;;  %v2303_v26 = vld [vmem:[%s2437_s15 + $0x8] sm:$0xff]   ;;  %v643_v27 = vshll.u32 %v2469_v21, 16  ;;  %v651_v30 = vshll.u32 %v2482_v24, 16 }
  0x15   : > { %2148 = vmatprep.subr.bf16.mxu1 %v2348_v1  ;;  %2170 = vmatprep.subr.bf16.mxu0 %v2348_v1  ;;  %v637_v23 = vrot.slane %v635_v19, 1  ;;  %v647_v32 = vshrl.u32 %v2469_v21, 16  ;;  %v655_v34 = vshrl.u32 %v2482_v24, 16  ;;  %v2322_v35 = vld [vmem:[%s2465_s20] sm:$0xff]   ;;  %v2323_v36 = vld [vmem:[%s2465_s20 + $0x8] sm:$0xff]   ;;  %v2324_v39 = vld [vmem:[%s2465_s20 + $0x10] sm:$0xff]  }
  0x16   : > { %v632_v18 = vrot.slane %v630_v13, 1  ;;  %v645_v33 = vrot.slane %v643_v27, 1  ;;  %v2501_v38 = vrot.slane %v651_v30, 1  ;;  %v1069_v40 = vshrl.u32 %v2322_v35, 16  ;;  %v1206_v44 = vld [vmem:[%s2437_s15 + $0x4] sm:$0xf] }
  0x17   : > { %v641_v37 = vor.u32 %v639_v29, %v637_v23  ;;  %v1071_v41 = vshll.u32 %v2322_v35, 16  ;;  %v1076_v42 = vshll.u32 %v2323_v36, 16  ;;  %v1080_v43 = vshrl.u32 %v2323_v36, 16  ;;  %v2306_v45 = vld [vmem:[%s2437_s15 + $0x10] sm:$0xff]   ;;  %v2512_v47 = vld [vmem:[%s2437_s15 + $0x8] sm:$0xf] }
  0x18   : > { %v633_v22 = vor.u32 %v632_v18, %v628_v17  ;;  %v1084_v46 = vshll.u32 %v2324_v39, 16  ;;  %v2515_v48 = vld [vmem:[%s2437_s15 + $0xc] sm:$0xff]   ;;  %v2518_v49 = vld [vmem:[%s2437_s15 + $0x20] sm:$0x1f]   ;;  %v1997_v52 = vcombine.low %v1206_v44, %v2512_v47  ;;  %v2327_v56 = vld [vmem:[%s2465_s20 + $0x18] sm:$0xff]   ;;  %v1088_v57 = vshrl.u32 %v2324_v39, 16 }
  0x19   : > { %v1073_v50 = vrot.slane %v1071_v41, 1  ;;  %v1078_v51 = vrot.slane %v1076_v42, 1  ;;  %v646_v53 = vsel %vm626_vm3, %v641_v37, %v645_v33  ;;  %v1251_v55 = vshll.u32 %v2515_v48, 16  ;;  %v2525_v2 = vld [vmem:[%s2437_s15 + $0x14] sm:$0xff]   ;;  %v2536_v7 = vld [vmem:[%s2465_s20 + $0x20] sm:$0x1f]  }
  0x1a   : > { %2089 = vmatmul.mubr.msk.bf16.gmra.mrb[4].mxu0 %vm384_vm2, %v2299_v9  ;;  %2101 = vmatmul.mubr.msk.bf16.gmra.mrb[4].mxu1 %vm384_vm2, %v2300_v10  ;;  %v638_v28 = vsel %vm626_vm3, %v633_v22, %v637_v23  ;;  %v1086_v54 = vrot.slane %v1084_v46, 1  ;;  %v1244_v60 = vshrl.u32 %v1997_v52, 16  ;;  %v1246_v61 = vshll.u32 %v1997_v52, 16  ;;  %v2554_v21 = vld [vmem:[%s2437_s15 + $0x24] sm:$0x1f]   ;;  %v2308_v29 = vld [vmem:[%s2437_s15 + $0x18] sm:$0xff]  }
  0x1b   : > { %2092 = vmatprep.mubr.msk.bf16.mxu0 %vm2349_vm1, %v2348_v1  ;;  %2106 = vmatprep.mubr.msk.bf16.mxu1 %vm2349_vm1, %v2348_v1  ;;  %v1074_v58 = vor.u32 %v1073_v50, %v1069_v40  ;;  %v1082_v59 = vor.u32 %v1080_v43, %v1078_v51  ;;  %v1253_v62 = vrot.slane %v1251_v55, 1  ;;  %v1092_v0 = vshll.u32 %v2327_v56, 16  ;;  %v2332_v22 = vld [vmem:[%s2426_s12 + $0x4] sm:$0xff]   ;;  %v2334_v43 = vld [vmem:[%s2426_s12 + $0x14] sm:$0xff]  }
  0x1c   : > { %v1090_v63 = vor.u32 %v1088_v57, %v1086_v54  ;;  %v1255_v3 = vshrl.u32 %v2515_v48, 16  ;;  %v1248_v6 = vrot.slane %v1246_v61, 1  ;;  %v1096_v8 = vshrl.u32 %v2327_v56, 16  ;;  %v2310_v61 = vld [vmem:[%s2437_s15 + $0x20] ss:$0 sps:$4 sm:$0xff]  }
  0x1d   : > { %v2530_v4 = vsel %vm626_vm3, %v1074_v58, %v1078_v51  ;;  %v2533_v5 = vsel %vm626_vm3, %v1082_v59, %v1086_v54  ;;  %v649_v9 = vor.u32 %v647_v32, %v645_v33  ;;  %v1094_v10 = vrot.slane %v1092_v0, 1  ;;  %v2336_v51 = vld [vmem:[%s2426_s12 + $0x1c] sm:$0xff]   ;;  %v2597_v58 = vld [vmem:[%s2426_s12 + $0x24] sm:$0x1f]  }
  0x1e   : > { %v1257_v11 = vor.u32 %v1255_v3, %v1253_v62  ;;  %v1259_v12 = vshll.u32 %v2525_v2, 16  ;;  %v659_v13 = vshll.u32 %v2518_v49, 16  ;;  %v1100_v15 = vshll.u32 %v2536_v7, 16 }
  0x1f   : > { %v1263_v17 = vshrl.u32 %v2525_v2, 16  ;;  %v2551_v18 = vsel %vm626_vm3, %v1090_v63, %v1094_v10  ;;  %v654_v30 = vsel %vm626_vm3, %v649_v9, %v2501_v38  ;;  %v1275_v33 = vshll.u32 %v2554_v21, 16 }
  0x20   : > { %v1261_v19 = vrot.slane %v1259_v12, 1  ;;  %v2560_v25 = vrot.slane %v1100_v15, 1  ;;  %v1419_v37 = vshrl.u32 %v2332_v22, 16  ;;  %v657_v39 = vor.u32 %v655_v34, %v2501_v38 }
  0x21   : > { %v2579_v40 = vrot.slane %v1275_v33, 1  ;;  %v1421_v41 = vshll.u32 %v2332_v22, 16  ;;  %v661_v44 = vrot.slane %v659_v13, 1  ;;  %v1434_v38 = vshll.u32 %v2334_v43, 16  ;;  %v2321_v33 = vld [vmem:[%s2475_s23 + $0x20] ss:$0 sps:$4 sm:$0xff]  }
  0x22   : > { %2093 = vmatmul.mubr.msk.bf16.gmra.mrb[8].mxu0 %vm384_vm2, %v2301_v14  ;;  %2107 = vmatmul.mubr.msk.bf16.vlgmr.msra.gmra.mrb[8].mxu1 %vm384_vm2, %v2302_v16  ;;  %v1249_v14 = vor.u32 %v1248_v6, %v1244_v60  ;;  %v2547_v16 = vld [vmem:[%s2437_s15 + $0x1c] sm:$0xff]   ;;  %v1265_v32 = vor.u32 %v1263_v17, %v1261_v19  ;;  %v1442_v57 = vshll.u32 %v2336_v51, 16  ;;  %v1446_v60 = vshrl.u32 %v2336_v51, 16  ;;  %v1996_v17 = vld [vmem:[%s2865_s4 + $0xc] sm:$0x3] }
  0x23   : > { %2128 = vmatprep.mubr.msk.bf16.mxu0 %vm2349_vm1, %v2348_v1  ;;  %2149 = vmatpush3.bf16.msra.mxu1 %v815_v20  ;;  %v1098_v20 = vor.u32 %v1096_v8, %v1094_v10  ;;  %v1271_v27 = vshrl.u32 %v2547_v16, 16  ;;  %v1423_v24 = vrot.slane %v1421_v41, 1  ;;  %v1436_v56 = vrot.slane %v1434_v38, 1 }
  0x24   : > { %2110 = vmatprep.mubr.msk.bf16.mxu1 %vm2349_vm1, %v2348_v1  ;;  %2192 = vmatprep.subr.bf16.mxu1 %v2348_v1  ;;  %v2558_v23 = vsel %vm626_vm3, %v1249_v14, %v1253_v62  ;;  %v662_v59 = vsel %vm626_vm3, %v657_v39, %v661_v44  ;;  %v1444_v3 = vrot.slane %v1442_v57, 1  ;;  %v1450_v6 = vshll.u32 %v2597_v58, 16  ;;  %v2312_v14 = vld [vmem:[%s2465_s20] sm:$0xff]   ;;  %v2018_v39 = vld [vmem:[%s2865_s4 + $0x10] sm:$0x3] }
  0x25   : > { %v2574_v35 = vsel %vm626_vm3, %v1098_v20, %v2560_v25  ;;  %v1424_v54 = vor.u32 %v1423_v24, %v1419_v37  ;;  %v663_v10 = vshrl.u32 %v2518_v49, 16  ;;  %v1985_v49 = vld [vmem:[%s2865_s4 + $0xa] sm:$0x3]  ;;  %v1298_v22 = vsel %vm400_vm0, %v1996_v17, 0 }
  0x26   : > { %v1448_v9 = vor.u32 %v1446_v60, %v1444_v3  ;;  %v1123_v15 = vsel %vm400_vm0, %v1985_v49, 0  ;;  %v2313_v20 = vld [vmem:[%s2465_s20 + $0x8] sm:$0xff]   ;;  %v1588_v41 = vsel %vm400_vm0, %v2018_v39, 0  ;;  %v1104_v24 = vshrl.u32 %v2536_v7, 16  ;;  %v1556_v7 = vld [vmem:[%s2437_s15 + $0x4] sm:$0xe] }
  0x27   : > { %v665_v13 = vor.u32 %v663_v10, %v661_v44  ;;  %v1689_v44 = vld [vmem:[%s2867_s6 + $0x10] sm:$0xff]  ;;  %v2019_v38 = vcombine.low %v1556_v7, %v2512_v47  ;;  %v1564_v51 = vrot.slane %v2515_v48, 1  ;;  %v1566_v47 = vrot.slane %v2525_v2, 1 }
  0x29   : > { %v1567_v48 = vsel %vm1562_vm4, %v1564_v51, %v1566_v47 }
  0x2a   : > { %2129 = vmatmul.mubr.msk.bf16.vlgmr.msra.gmra.mrb[12].mxu0 %vm384_vm2, %v638_v28  ;;  %2111 = vmatmul.mubr.msk.bf16.gmra.mrb[12].mxu1 %vm384_vm2, %v2303_v26  ;;  %v1267_v26 = vshll.u32 %v2547_v16, 16  ;;  %v2333_v28 = vld [vmem:[%s2426_s12 + $0xc] sm:$0xff]   ;;  %s2283_s12 = smul.u32 72, %s2870_s25 }
  0x2b   : > { %2171 = vmatpush3.bf16.msra.mxu0 %v948_v31  ;;  %2114 = vmatprep.mubr.msk.bf16.mxu1 %vm2349_vm1, %v2348_v1  ;;  %v2569_v31 = vsel %vm626_vm3, %v1257_v11, %v1261_v19  ;;  %v1426_v42 = vshll.u32 %v2333_v28, 16  ;;  %v1430_v50 = vshrl.u32 %v2333_v28, 16  ;;  %v2613_v11 = vrot.slane %v1450_v6, 1  ;;  %v2314_v19 = vld [vmem:[%s2475_s23] sm:$0xff]   ;;  %v2318_v28 = vld [vmem:[%s2475_s23 + $0x10] sm:$0xff]  }
  0x2c   : > { %2132 = vmatprep.mubr.msk.bf16.mxu0 %vm2349_vm1, %v2348_v1  ;;  %2214 = vmatprep.subr.bf16.mxu0 %v2348_v1  ;;  %v1269_v36 = vrot.slane %v1267_v26, 1  ;;  %v2316_v26 = vld [vmem:[%s2475_s23 + $0x8] sm:$0xff]   ;;  %s338_s16 = scalar_lea.vmem %s2868_s7, %s2283_s12 }
  0x2d   : > { %v1428_v34 = vrot.slane %v1426_v42, 1  ;;  %v2622_v12 = vsel %vm626_vm3, %v1448_v9, %v2613_v11  ;;  %v2350_v42 = vmov 0  }
  0x2e   : > { %v1273_v46 = vor.u32 %v1271_v27, %v1269_v36  ;;  %v2315_v27 = vld [vmem:[%s2465_s20 + $0x10] sm:$0xff]   ;;  %2295 = vset.pattern.permute.xlu0 %v2350_v42  ;;  %2296 = vset.pattern.permute.xlu1 %v2350_v42 }
  0x2f   : > { %v1432_v55 = vor.u32 %v1430_v50, %v1428_v34  ;;  %v2602_v62 = vsel %vm626_vm3, %v1424_v54, %v1428_v34  ;;  %1708 = vperm.xlu1 %2296, %v1689_v44   ;;  %v1695_v50 = vld [vmem:[%s2867_s6 + $0x40] sm:$0xff]  ;;  %v1106_v34 = vor.u32 %v1104_v24, %v2560_v25  ;;  %v1563_v25 = vrot.slane %v2019_v38, 1 }
  0x30   : > { %v2594_v52 = vsel %vm626_vm3, %v1273_v46, %v2579_v40  ;;  %v1693_v46 = vld [vmem:[%s2867_s6 + $0x30] sm:$0xff]  ;;  %v1570_v54 = vrot.slane %v2554_v21, 1 }
  0x31   : > { %v2605_v63 = vsel %vm626_vm3, %v1432_v55, %v1436_v56 }
  0x32   : > { %2133 = vmatmul.mubr.msk.bf16.gmra.mrb[16].mxu0 %vm384_vm2, %v646_v53  ;;  %2115 = vmatmul.mubr.msk.bf16.gmra.mrb[16].mxu1 %vm384_vm2, %v2306_v45  ;;  %v2584_v45 = vsel %vm626_vm3, %v1265_v32, %v1269_v36  ;;  %v1438_v53 = vshrl.u32 %v2334_v43, 16  ;;  %v2319_v32 = vld [vmem:[%s2465_s20 + $0x20] ss:$0 sps:$4 sm:$0xff]   ;;  %v2007_v36 = vld [vmem:[%s2865_s4 + $0xe] sm:$0x3] }
  0x33   : > { %2136 = vmatprep.mubr.msk.bf16.mxu0 %vm2349_vm1, %v2348_v1  ;;  %2118 = vmatprep.mubr.msk.bf16.mxu1 %vm2349_vm1, %v2348_v1  ;;  %v1473_v37 = vsel %vm400_vm0, %v2007_v36, 0  ;;  %v1687_v43 = vld [vmem:[%s2867_s6] sm:$0xff] }
  0x34   : > { %v1440_v0 = vor.u32 %v1438_v53, %v1436_v56  ;;  %1698 = vperm.xlu0 %2295, %v1687_v43   ;;  %v1454_v53 = vshrl.u32 %v2597_v58, 16 }
  0x36   : > { %v2609_v8 = vsel %vm626_vm3, %v1440_v0, %v1444_v3 }
  0x3a   : > { %2137 = vmatmul.mubr.msk.bf16.gmra.mrb[20].mxu0 %vm384_vm2, %v654_v30  ;;  %2119 = vmatmul.mubr.msk.bf16.gmra.mrb[20].mxu1 %vm384_vm2, %v2308_v29  ;;  %v2317_v29 = vld [vmem:[%s2465_s20 + $0x18] sm:$0xff]  }
  0x3b   : > { %2140 = vmatprep.mubr.msk.bf16.mxu0 %vm2349_vm1, %v2348_v1  ;;  %2122 = vmatprep.mubr.msk.bf16.mxu1 %vm2349_vm1, %v2348_v1  ;;  %v2320_v30 = vld [vmem:[%s2475_s23 + $0x18] sm:$0xff]  }
  0x42   : > { %2141 = vmatmul.mubr.msk.bf16.gmra.mrb[24].mxu0 %vm384_vm2, %v662_v59  ;;  %2123 = vmatmul.mubr.msk.bf16.gmra.mrb[24].mxu1 %vm384_vm2, %v2310_v61 }
  0x43   : > { %2144 = vmatprep.mubr.msk.bf16.mxu0 %vm2349_vm1, %v2348_v1  ;;  %2150 = vmatprep.mubr.msk.bf16.mxu1 %vm2349_vm1, %v2348_v1 }
  0x4a   : > { %2145 = vmatmul.mubr.msk.bf16.gmra.mrb[28].mxu0 %vm384_vm2, %v665_v13  ;;  %2151 = vmatmul.mubr.msk.bf16.vlgmr.msra.gmra.mrb[28].mxu1 %vm384_vm2, %v2312_v14 }
  0x4b   : > { %2172 = vmatprep.mubr.msk.bf16.mxu0 %vm2349_vm1, %v2348_v1  ;;  %2193 = vmatpush3.bf16.msra.mxu1 %v1123_v15 }
  0x4c   : > { %2154 = vmatprep.mubr.msk.bf16.mxu1 %vm2349_vm1, %v2348_v1  ;;  %2236 = vmatprep.subr.bf16.mxu1 %v2348_v1 }
  0x52   : > { %2173 = vmatmul.mubr.msk.bf16.vlgmr.msra.gmra.mrb[32].mxu0 %vm384_vm2, %v2314_v19  ;;  %2155 = vmatmul.mubr.msk.bf16.gmra.mrb[32].mxu1 %vm384_vm2, %v2313_v20 }
  0x53   : > { %2215 = vmatpush3.bf16.msra.mxu0 %v1298_v22  ;;  %2158 = vmatprep.mubr.msk.bf16.mxu1 %vm2349_vm1, %v2348_v1 }
  0x54   : > { %2176 = vmatprep.mubr.msk.bf16.mxu0 %vm2349_vm1, %v2348_v1  ;;  %2258 = vmatprep.subr.bf16.mxu0 %v2348_v1 }
  0x5a   : > { %2177 = vmatmul.mubr.msk.bf16.gmra.mrb[36].mxu0 %vm384_vm2, %v2316_v26  ;;  %2159 = vmatmul.mubr.msk.bf16.gmra.mrb[36].mxu1 %vm384_vm2, %v2315_v27 }
  0x5b   : > { %2180 = vmatprep.mubr.msk.bf16.mxu0 %vm2349_vm1, %v2348_v1  ;;  %2162 = vmatprep.mubr.msk.bf16.mxu1 %vm2349_vm1, %v2348_v1 }
  0x62   : > { %2181 = vmatmul.mubr.msk.bf16.gmra.mrb[40].mxu0 %vm384_vm2, %v2318_v28  ;;  %2163 = vmatmul.mubr.msk.bf16.gmra.mrb[40].mxu1 %vm384_vm2, %v2317_v29 }
  0x63   : > { %2184 = vmatprep.mubr.msk.bf16.mxu0 %vm2349_vm1, %v2348_v1  ;;  %2166 = vmatprep.mubr.msk.bf16.mxu1 %vm2349_vm1, %v2348_v1 }
  0x6a   : > { %2185 = vmatmul.mubr.msk.bf16.gmra.mrb[44].mxu0 %vm384_vm2, %v2320_v30  ;;  %2167 = vmatmul.mubr.msk.bf16.gmra.mrb[44].mxu1 %vm384_vm2, %v2319_v32 }
  0x6b   : > { %2188 = vmatprep.mubr.msk.bf16.mxu0 %vm2349_vm1, %v2348_v1  ;;  %2194 = vmatprep.mubr.msk.bf16.mxu1 %vm2349_vm1, %v2348_v1 }
  0x72   : > { %2189 = vmatmul.mubr.msk.bf16.gmra.mrb[48].mxu0 %vm384_vm2, %v2321_v33  ;;  %2195 = vmatmul.mubr.msk.bf16.vlgmr.msra.gmra.mrb[48].mxu1 %vm384_vm2, %v2530_v4  ;;  %v1688_v4 = vld [vmem:[%s2867_s6 + $0x8] sm:$0xff] }
  0x73   : > { %2216 = vmatprep.mubr.msk.bf16.mxu0 %vm2349_vm1, %v2348_v1  ;;  %2237 = vmatpush3.bf16.msra.mxu1 %v1473_v37 }
  0x74   : > { %2198 = vmatprep.mubr.msk.bf16.mxu1 %vm2349_vm1, %v2348_v1  ;;  %1703 = vperm.xlu0 %2295, %v1688_v4  }
  0x7a   : > { %2217 = vmatmul.mubr.msk.bf16.vlgmr.msra.gmra.mrb[52].mxu0 %vm384_vm2, %v2558_v23  ;;  %2199 = vmatmul.mubr.msk.bf16.gmra.mrb[52].mxu1 %vm384_vm2, %v2533_v5  ;;  %v1691_v23 = vld [vmem:[%s2867_s6 + $0x20] sm:$0xff]  ;;  %v1690_v5 = vld [vmem:[%s2867_s6 + $0x18] sm:$0xff] }
  0x7b   : > { %2259 = vmatpush3.bf16.msra.mxu0 %v1588_v41  ;;  %2202 = vmatprep.mubr.msk.bf16.mxu1 %vm2349_vm1, %v2348_v1 }
  0x7c   : > { %2220 = vmatprep.mubr.msk.bf16.mxu0 %vm2349_vm1, %v2348_v1  ;;  %1718 = vperm.xlu0 %2295, %v1691_v23  }
  0x7d   : > { %1713 = vperm.xlu1 %2296, %v1690_v5  }
  0x80   : > { %1728 = vperm.xlu0 %2295, %v1693_v46  }
  0x82   : > { %2221 = vmatmul.mubr.msk.bf16.gmra.mrb[56].mxu0 %vm384_vm2, %v2569_v31  ;;  %2203 = vmatmul.mubr.msk.bf16.gmra.mrb[56].mxu1 %vm384_vm2, %v2551_v18  ;;  %v1692_v31 = vld [vmem:[%s2867_s6 + $0x28] sm:$0xff]  ;;  %v1694_v18 = vld [vmem:[%s2867_s6 + $0x38] sm:$0xff] }
  0x83   : > { %2224 = vmatprep.mubr.msk.bf16.mxu0 %vm2349_vm1, %v2348_v1  ;;  %2206 = vmatprep.mubr.msk.bf16.mxu1 %vm2349_vm1, %v2348_v1 }
  0x84   : > { %1723 = vperm.xlu1 %2296, %v1692_v31   ;;  %1738 = vperm.xlu0 %2295, %v1695_v50  }
  0x88   : > { %1733 = vperm.xlu1 %2296, %v1694_v18  }
  0x8a   : > { %2225 = vmatmul.mubr.msk.bf16.gmra.mrb[60].mxu0 %vm384_vm2, %v2584_v45  ;;  %2207 = vmatmul.mubr.msk.bf16.gmra.mrb[60].mxu1 %vm384_vm2, %v2574_v35  ;;  %v1279_v45 = vshrl.u32 %v2554_v21, 16 }
  0x8b   : > { %2228 = vmatprep.mubr.msk.bf16.mxu0 %vm2349_vm1, %v2348_v1  ;;  %2210 = vmatprep.mubr.msk.bf16.mxu1 %vm2349_vm1, %v2348_v1 }
  0x8c   : > { %v1281_v35 = vor.u32 %v1279_v45, %v2579_v40  ;;  %v1568_v40 = vrot.slane %v2547_v16, 1  ;;  %v1456_v16 = vor.u32 %v1454_v53, %v2613_v11 }
  0x8e   : > { %v1569_v2 = vsel %vm1562_vm4, %v1566_v47, %v1568_v40  ;;  %v1571_v55 = vsel %vm1562_vm4, %v1568_v40, %v1570_v54 }
  0x92   : > { %2229 = vmatmul.mubr.msk.bf16.gmra.mrb[64].mxu0 %vm384_vm2, %v2594_v52  ;;  %2211 = vmatmul.mubr.msk.bf16.gmra.mrb[64].mxu1 %vm384_vm2, %v1106_v34  ;;  %v1565_v52 = vsel %vm1562_vm4, %v1563_v25, %v1564_v51 }
  0x93   : > { %2232 = vmatprep.mubr.msk.bf16.mxu0 %vm2349_vm1, %v2348_v1  ;;  %2238 = vmatprep.mubr.msk.bf16.mxu1 %vm2349_vm1, %v2348_v1 }
  0x9a   : > { %2233 = vmatmul.mubr.msk.bf16.gmra.mrb[68].mxu0 %vm384_vm2, %v1281_v35  ;;  %2239 = vmatmul.mubr.msk.bf16.vlgmr.msra.gmra.mrb[68].mxu1 %vm384_vm2, %v2602_v62 }
  0x9b   : > { %2260 = vmatprep.mubr.msk.bf16.mxu0 %vm2349_vm1, %v2348_v1  ;;  %2242 = vmatprep.mubr.msk.bf16.mxu1 %vm2349_vm1, %v2348_v1 }
  0xa2   : > { %2261 = vmatmul.mubr.msk.bf16.vlgmr.msra.gmra.mrb[72].mxu0 %vm384_vm2, %v1565_v52  ;;  %2243 = vmatmul.mubr.msk.bf16.gmra.mrb[72].mxu1 %vm384_vm2, %v2605_v63 }
  0xa3   : > { %2264 = vmatprep.mubr.msk.bf16.mxu0 %vm2349_vm1, %v2348_v1  ;;  %2246 = vmatprep.mubr.msk.bf16.mxu1 %vm2349_vm1, %v2348_v1 }
  0xaa   : > { %2265 = vmatmul.mubr.msk.bf16.gmra.mrb[76].mxu0 %vm384_vm2, %v1567_v48  ;;  %2247 = vmatmul.mubr.msk.bf16.gmra.mrb[76].mxu1 %vm384_vm2, %v2609_v8 }
  0xab   : > { %2268 = vmatprep.mubr.msk.bf16.mxu0 %vm2349_vm1, %v2348_v1  ;;  %2250 = vmatprep.mubr.msk.bf16.mxu1 %vm2349_vm1, %v2348_v1 }
  0xb2   : > { %2269 = vmatmul.mubr.msk.bf16.gmra.mrb[80].mxu0 %vm384_vm2, %v1569_v2  ;;  %2251 = vmatmul.mubr.msk.bf16.gmra.mrb[80].mxu1 %vm384_vm2, %v2622_v12 }
  0xb3   : > { %2272 = vmatprep.mubr.msk.bf16.mxu0 %vm2349_vm1, %v2348_v1  ;;  %2254 = vmatprep.mubr.msk.bf16.mxu1 %vm2349_vm1, %v2348_v1 }
  0xba   : > { %2273 = vmatmul.mubr.msk.bf16.gmra.mrb[84].mxu0 %vm384_vm2, %v1571_v55  ;;  %2255 = vmatmul.mubr.msk.bf16.gmra.mrb[84].mxu1 %vm384_vm2, %v1456_v16 }
  0xbb   : > { %2276 = vmatprep.mubr.msk.bf16.mxu0 %vm2349_vm1, %v2348_v1 }
  0xc2   : > { %2277 = vmatmul.mubr.msk.bf16.gmra.mrb[88].mxu0 %vm384_vm2, %v1570_v54 }
  0xe5   : > { %v438_v56 = vpop.f32.mrb[0].mxu0  ;;  %v462_v58 = vpop.f32.mrb[0].mxu1 }
  0xe6   : > { %v2086_v57 = vpop.f32.mrb[1].mxu0  ;;  %v2098_v59 = vpop.f32.mrb[1].mxu1 }
  0xe7   : > { %v441_v21 = vpop.f32.mrb[2].mxu0  ;;  %v465_v61 = vpop.f32.mrb[2].mxu1 }
  0xe8   : > { %v2087_v60 = vpop.f32.mrb[3].mxu0  ;;  %v2099_v62 = vpop.f32.mrb[3].mxu1 }
  0xed   : > { %v446_v63 = vpop.f32.mrb[4].mxu0  ;;  %v470_v3 = vpop.f32.mrb[4].mxu1 }
  0xee   : > { %v2090_v0 = vpop.f32.mrb[5].mxu0  ;;  %v2102_v8 = vpop.f32.mrb[5].mxu1 }
  0xef   : > { %v449_v6 = vpop.f32.mrb[6].mxu0  ;;  %v473_v10 = vpop.f32.mrb[6].mxu1 }
  0xf0   : > { %v2091_v9 = vpop.f32.mrb[7].mxu0  ;;  %v2103_v11 = vpop.f32.mrb[7].mxu1 }
  0xf5   : > { %v454_v12 = vpop.f32.mrb[8].mxu0  ;;  %v551_v1 = vpop.f32.mrb[8].mxu1 }
  0xf6   : > { %v2094_v13 = vpop.f32.mrb[9].mxu0  ;;  %v552_v49 = vadd.f32 %v551_v1, %v438_v56  ;;  %v2108_v14 = vpop.f32.mrb[9].mxu1 }
  0xf7   : > { %v457_v15 = vpop.f32.mrb[10].mxu0  ;;  %v554_v17 = vpop.f32.mrb[10].mxu1 }
  0xf8   : > { %v2095_v19 = vpop.f32.mrb[11].mxu0  ;;  %v555_v20 = vadd.f32 %v554_v17, %v441_v21  ;;  %v2109_v22 = vpop.f32.mrb[11].mxu1 }
  0xfd   : > { %v718_v26 = vpop.f32.mrb[12].mxu0  ;;  %v559_v27 = vpop.f32.mrb[12].mxu1 }
  0xfe   : > { %v756_v28 = vadd.f32 %v718_v26, %v552_v49  ;;  %v2130_v29 = vpop.f32.mrb[13].mxu0  ;;  %v560_v30 = vadd.f32 %v559_v27, %v446_v63  ;;  %v2112_v32 = vpop.f32.mrb[13].mxu1 }
  0xff   : > { %v721_v33 = vpop.f32.mrb[14].mxu0  ;;  %v562_v36 = vpop.f32.mrb[14].mxu1 }
 0x100   : > { %v757_v37 = vadd.f32 %v721_v33, %v555_v20  ;;  %v2131_v39 = vpop.f32.mrb[15].mxu0  ;;  %v563_v41 = vadd.f32 %v562_v36, %v449_v6  ;;  %v2113_v42 = vpop.f32.mrb[15].mxu1 }
 0x105   : > { %v726_v43 = vpop.f32.mrb[16].mxu0  ;;  %v567_v4 = vpop.f32.mrb[16].mxu1 }
 0x106   : > { %v758_v44 = vadd.f32 %v726_v43, %v560_v30  ;;  %v2134_v23 = vpop.f32.mrb[17].mxu0  ;;  %v568_v5 = vadd.f32 %v567_v4, %v454_v12  ;;  %v2116_v46 = vpop.f32.mrb[17].mxu1 }
 0x107   : > { %v729_v31 = vpop.f32.mrb[18].mxu0  ;;  %v570_v50 = vpop.f32.mrb[18].mxu1 }
 0x108   : > { %v759_v18 = vadd.f32 %v729_v31, %v563_v41  ;;  %v2135_v24 = vpop.f32.mrb[19].mxu0  ;;  %v571_v34 = vadd.f32 %v570_v50, %v457_v15  ;;  %v2117_v45 = vpop.f32.mrb[19].mxu1 }
 0x10d   : > { %v734_v7 = vpop.f32.mrb[20].mxu0  ;;  %v575_v35 = vpop.f32.mrb[20].mxu1 }
 0x10e   : > { %v760_v38 = vadd.f32 %v734_v7, %v568_v5  ;;  %v2138_v25 = vpop.f32.mrb[21].mxu0  ;;  %v576_v51 = vadd.f32 %v575_v35, %v462_v58  ;;  %v2120_v52 = vpop.f32.mrb[21].mxu1 }
 0x10f   : > { %v737_v47 = vpop.f32.mrb[22].mxu0  ;;  %v578_v48 = vpop.f32.mrb[22].mxu1 }
 0x110   : > { %v761_v40 = vadd.f32 %v737_v47, %v571_v34  ;;  %v2139_v2 = vpop.f32.mrb[23].mxu0  ;;  %v579_v53 = vadd.f32 %v578_v48, %v465_v61  ;;  %v2121_v54 = vpop.f32.mrb[23].mxu1 }
 0x115   : > { %v742_v16 = vpop.f32.mrb[24].mxu0  ;;  %v583_v55 = vpop.f32.mrb[24].mxu1 }
 0x116   : > { %v762_v56 = vadd.f32 %v742_v16, %v576_v51  ;;  %v2142_v57 = vpop.f32.mrb[25].mxu0  ;;  %v584_v21 = vadd.f32 %v583_v55, %v470_v3  ;;  %v2124_v60 = vpop.f32.mrb[25].mxu1 }
 0x117   : > { %v745_v59 = vpop.f32.mrb[26].mxu0  ;;  %v586_v0 = vpop.f32.mrb[26].mxu1 }
 0x118   : > { %v763_v62 = vadd.f32 %v745_v59, %v579_v53  ;;  %v2143_v63 = vpop.f32.mrb[27].mxu0  ;;  %v2125_v6 = vpop.f32.mrb[27].mxu1 }
 0x11d   : > { %v750_v8 = vpop.f32.mrb[28].mxu0  ;;  %v851_v9 = vpop.f32.mrb[28].mxu1 }
 0x11e   : > { %v764_v58 = vadd.f32 %v750_v8, %v584_v21  ;;  %v2146_v10 = vpop.f32.mrb[29].mxu0  ;;  %v889_v11 = vadd.f32 %v851_v9, %v756_v28  ;;  %v2152_v12 = vpop.f32.mrb[29].mxu1 }
 0x11f   : > { %v753_v1 = vpop.f32.mrb[30].mxu0  ;;  %v854_v61 = vpop.f32.mrb[30].mxu1 }
 0x120   : > { %v2147_v13 = vpop.f32.mrb[31].mxu0  ;;  %v890_v49 = vadd.f32 %v854_v61, %v757_v37  ;;  %v2153_v14 = vpop.f32.mrb[31].mxu1 }
 0x125   : > { %v984_v15 = vpop.f32.mrb[32].mxu0  ;;  %v859_v17 = vpop.f32.mrb[32].mxu1 }
 0x126   : > { %v1022_v3 = vadd.f32 %v984_v15, %v889_v11  ;;  %v2174_v19 = vpop.f32.mrb[33].mxu0  ;;  %v891_v20 = vadd.f32 %v859_v17, %v758_v44  ;;  %v2156_v22 = vpop.f32.mrb[33].mxu1 }
 0x127   : > { %v987_v26 = vpop.f32.mrb[34].mxu0  ;;  %v862_v27 = vpop.f32.mrb[34].mxu1 }
 0x128   : > { %v1023_v29 = vadd.f32 %v987_v26, %v890_v49  ;;  %v2175_v30 = vpop.f32.mrb[35].mxu0  ;;  %v892_v32 = vadd.f32 %v862_v27, %v759_v18  ;;  %v2157_v33 = vpop.f32.mrb[35].mxu1 }
 0x12d   : > { %v992_v36 = vpop.f32.mrb[36].mxu0  ;;  %v867_v28 = vpop.f32.mrb[36].mxu1 }
 0x12e   : > { %v1024_v39 = vadd.f32 %v992_v36, %v891_v20  ;;  %v2178_v41 = vpop.f32.mrb[37].mxu0  ;;  %v893_v42 = vadd.f32 %v867_v28, %v760_v38  ;;  %v2160_v43 = vpop.f32.mrb[37].mxu1 }
 0x12f   : > { %v995_v37 = vpop.f32.mrb[38].mxu0  ;;  %v870_v4 = vpop.f32.mrb[38].mxu1 }
 0x130   : > { %v1025_v23 = vadd.f32 %v995_v37, %v892_v32  ;;  %v2179_v5 = vpop.f32.mrb[39].mxu0  ;;  %v894_v46 = vadd.f32 %v870_v4, %v761_v40  ;;  %v2161_v31 = vpop.f32.mrb[39].mxu1 }
 0x135   : > { %v1000_v44 = vpop.f32.mrb[40].mxu0  ;;  %v875_v50 = vpop.f32.mrb[40].mxu1 }
 0x136   : > { %v1026_v24 = vadd.f32 %v1000_v44, %v893_v42  ;;  %v2182_v34 = vpop.f32.mrb[41].mxu0  ;;  %v895_v45 = vadd.f32 %v875_v50, %v762_v56  ;;  %v2164_v7 = vpop.f32.mrb[41].mxu1 }
 0x137   : > { %v1003_v18 = vpop.f32.mrb[42].mxu0  ;;  %v878_v35 = vpop.f32.mrb[42].mxu1 }
 0x138   : > { %v1027_v25 = vadd.f32 %v1003_v18, %v894_v46  ;;  %v2183_v51 = vpop.f32.mrb[43].mxu0  ;;  %v896_v52 = vadd.f32 %v878_v35, %v763_v62  ;;  %v2165_v47 = vpop.f32.mrb[43].mxu1 }
 0x13d   : > { %v1008_v38 = vpop.f32.mrb[44].mxu0  ;;  %v883_v48 = vpop.f32.mrb[44].mxu1 }
 0x13e   : > { %v1028_v2 = vadd.f32 %v1008_v38, %v895_v45  ;;  %v2186_v53 = vpop.f32.mrb[45].mxu0  ;;  %v897_v54 = vadd.f32 %v883_v48, %v764_v58  ;;  %v2168_v40 = vpop.f32.mrb[45].mxu1 }
 0x13f   : > { %v1011_v16 = vpop.f32.mrb[46].mxu0  ;;  %v886_v21 = vpop.f32.mrb[46].mxu1 }
 0x140   : > { %v1029_v55 = vadd.f32 %v1011_v16, %v896_v52  ;;  %v2187_v57 = vpop.f32.mrb[47].mxu0  ;;  %v2169_v59 = vpop.f32.mrb[47].mxu1 }
 0x145   : > { %v1016_v60 = vpop.f32.mrb[48].mxu0  ;;  %v1159_v63 = vpop.f32.mrb[48].mxu1 }
 0x146   : > { %v1030_v56 = vadd.f32 %v1016_v60, %v897_v54  ;;  %v2190_v0 = vpop.f32.mrb[49].mxu0  ;;  %v1197_v6 = vadd.f32 %v1159_v63, %v1022_v3  ;;  %v2196_v8 = vpop.f32.mrb[49].mxu1 }
 0x147   : > { %v1019_v9 = vpop.f32.mrb[50].mxu0  ;;  %v1162_v62 = vpop.f32.mrb[50].mxu1 }
 0x148   : > { %v2191_v10 = vpop.f32.mrb[51].mxu0  ;;  %v1198_v11 = vadd.f32 %v1162_v62, %v1023_v29  ;;  %v2197_v12 = vpop.f32.mrb[51].mxu1  ;;  %v2805_v62 = vld [vmem:[%s2866_s5] ss:$0 sm:$0xff] }
 0x14d   : > { %v1334_v1 = vpop.f32.mrb[52].mxu0  ;;  %v1167_v61 = vpop.f32.mrb[52].mxu1 }
 0x14e   : > { %v1372_v58 = vadd.f32 %v1334_v1, %v1197_v6  ;;  %v2218_v13 = vpop.f32.mrb[53].mxu0  ;;  %v1199_v49 = vadd.f32 %v1167_v61, %v1024_v39  ;;  %v2200_v14 = vpop.f32.mrb[53].mxu1 }
 0x14f   : > { %v1337_v15 = vpop.f32.mrb[54].mxu0  ;;  %v1170_v17 = vpop.f32.mrb[54].mxu1 }
 0x150   : > { %v1373_v19 = vadd.f32 %v1337_v15, %v1198_v11  ;;  %v2219_v20 = vpop.f32.mrb[55].mxu0  ;;  %v1200_v22 = vadd.f32 %v1170_v17, %v1025_v23  ;;  %v2201_v26 = vpop.f32.mrb[55].mxu1 }
 0x155   : > { %v1342_v27 = vpop.f32.mrb[56].mxu0  ;;  %v1175_v3 = vpop.f32.mrb[56].mxu1 }
 0x156   : > { %v1374_v30 = vadd.f32 %v1342_v27, %v1199_v49  ;;  %v2222_v32 = vpop.f32.mrb[57].mxu0  ;;  %v1201_v33 = vadd.f32 %v1175_v3, %v1026_v24  ;;  %v2204_v36 = vpop.f32.mrb[57].mxu1 }
 0x157   : > { %v1345_v29 = vpop.f32.mrb[58].mxu0  ;;  %v1178_v28 = vpop.f32.mrb[58].mxu1 }
 0x158   : > { %v1375_v41 = vadd.f32 %v1345_v29, %v1200_v22  ;;  %v2223_v42 = vpop.f32.mrb[59].mxu0  ;;  %v1202_v43 = vadd.f32 %v1178_v28, %v1027_v25  ;;  %v2205_v37 = vpop.f32.mrb[59].mxu1 }
 0x159   : > { %v1709_v27 = vpop.permute.xlu1 %1708 }
 0x15d   : > { %v1350_v39 = vpop.f32.mrb[60].mxu0  ;;  %v1183_v4 = vpop.f32.mrb[60].mxu1 }
 0x15e   : > { %v1376_v5 = vadd.f32 %v1350_v39, %v1201_v33  ;;  %v2226_v46 = vpop.f32.mrb[61].mxu0  ;;  %v1203_v31 = vadd.f32 %v1183_v4, %v1028_v2  ;;  %v2208_v44 = vpop.f32.mrb[61].mxu1 }
 0x15f   : > { %v1353_v23 = vpop.f32.mrb[62].mxu0  ;;  %v1186_v50 = vpop.f32.mrb[62].mxu1 }
 0x160   : > { %v1377_v34 = vadd.f32 %v1353_v23, %v1202_v43  ;;  %v2227_v45 = vpop.f32.mrb[63].mxu0  ;;  %v1204_v7 = vadd.f32 %v1186_v50, %v1029_v55  ;;  %v2209_v18 = vpop.f32.mrb[63].mxu1 }
 0x161   : > { %v1714_v50 = vpop.permute.xlu1 %1713 }
 0x165   : > { %v1358_v24 = vpop.f32.mrb[64].mxu0  ;;  %v1191_v35 = vpop.f32.mrb[64].mxu1 }
 0x166   : > { %v2796_v51 = vadd.f32 %v1358_v24, %v1203_v31  ;;  %v2230_v52 = vpop.f32.mrb[65].mxu0  ;;  %v1205_v47 = vadd.f32 %v1191_v35, %v1030_v56  ;;  %v2212_v38 = vpop.f32.mrb[65].mxu1 }
 0x167   : > { %v1361_v25 = vpop.f32.mrb[66].mxu0  ;;  %v1194_v54 = vpop.f32.mrb[66].mxu1 }
 0x168   : > { %v2798_v48 = vadd.f32 %v1361_v25, %v1204_v7  ;;  %v2231_v53 = vpop.f32.mrb[67].mxu0  ;;  %v2213_v2 = vpop.f32.mrb[67].mxu1 }
 0x169   : > { %v1699_v56 = vpop.permute.xlu0 %1698 }
 0x16d   : > { %v1366_v16 = vpop.f32.mrb[68].mxu0  ;;  %v1509_v57 = vpop.f32.mrb[68].mxu1 }
 0x16e   : > { %v2800_v40 = vadd.f32 %v1366_v16, %v1205_v47  ;;  %v2234_v21 = vpop.f32.mrb[69].mxu0  ;;  %v1547_v55 = vadd.f32 %v1509_v57, %v1372_v58  ;;  %v2240_v59 = vpop.f32.mrb[69].mxu1 }
 0x16f   : > { %v1369_v60 = vpop.f32.mrb[70].mxu0  ;;  %v1512_v63 = vpop.f32.mrb[70].mxu1 }
 0x170   : > { %v2235_v0 = vpop.f32.mrb[71].mxu0  ;;  %v1548_v6 = vadd.f32 %v1512_v63, %v1373_v19  ;;  %v2241_v8 = vpop.f32.mrb[71].mxu1 }
 0x171   : > { %v1704_v19 = vpop.permute.xlu0 %1703 }
 0x175   : > { %v1624_v9 = vpop.f32.mrb[72].mxu0  ;;  %v1517_v10 = vpop.f32.mrb[72].mxu1 }
 0x176   : > { %v1662_v11 = vadd.f32 %v1624_v9, %v1547_v55  ;;  %v2262_v12 = vpop.f32.mrb[73].mxu0  ;;  %v1549_v1 = vadd.f32 %v1517_v10, %v1374_v30  ;;  %v2244_v61 = vpop.f32.mrb[73].mxu1 }
 0x177   : > { %v1627_v13 = vpop.f32.mrb[74].mxu0  ;;  %v1520_v49 = vpop.f32.mrb[74].mxu1 }
 0x178   : > { %v2808_v58 = vadd.f32 %v2805_v62, %v1662_v11  ;;  %v1663_v14 = vadd.f32 %v1627_v13, %v1548_v6  ;;  %v2263_v15 = vpop.f32.mrb[75].mxu0  ;;  %v1550_v17 = vadd.f32 %v1520_v49, %v1375_v41  ;;  %v2245_v20 = vpop.f32.mrb[75].mxu1 }
 0x179   : > { %v1719_v0 = vpop.permute.xlu0 %1718  ;;  %v1724_v10 = vpop.permute.xlu1 %1723 }
 0x17a   : > { %v1741_v22 = vmul.f32 %v1699_v56, %v2808_v58  ;;  %v2812_v26 = vadd.f32 %v2805_v62, %v1663_v14 }
 0x17c   : > { %v1742_v3 = vmul.f32 %v1704_v19, %v2812_v26  ;;  %v1765_v32 = vmul.f32 %v1741_v22, %v2808_v58 }
 0x17d   : > { %v1632_v30 = vpop.f32.mrb[76].mxu0  ;;  %v1525_v29 = vpop.f32.mrb[76].mxu1 }
 0x17e   : > { %v1750_v33 = vadd.f32 %v1742_v3, %v1741_v22  ;;  %v1766_v36 = vmul.f32 %v1742_v3, %v2812_v26  ;;  %v1664_v28 = vadd.f32 %v1632_v30, %v1549_v1  ;;  %v2266_v42 = vpop.f32.mrb[77].mxu0  ;;  %v1551_v41 = vadd.f32 %v1525_v29, %v1376_v5  ;;  %v2248_v43 = vpop.f32.mrb[77].mxu1 }
 0x17f   : > { %v1635_v37 = vpop.f32.mrb[78].mxu0  ;;  %v1528_v46 = vpop.f32.mrb[78].mxu1 }
 0x180   : > { %v1774_v39 = vadd.f32 %v1766_v36, %v1765_v32  ;;  %v2818_v4 = vadd.f32 %v2805_v62, %v1664_v28  ;;  %v1665_v31 = vadd.f32 %v1635_v37, %v1550_v17  ;;  %v2267_v44 = vpop.f32.mrb[79].mxu0  ;;  %v1552_v23 = vadd.f32 %v1528_v46, %v1377_v34  ;;  %v2249_v45 = vpop.f32.mrb[79].mxu1 }
 0x181   : > { %v1734_v42 = vpop.permute.xlu1 %1733 }
 0x182   : > { %v1743_v7 = vmul.f32 %v1709_v27, %v2818_v4  ;;  %v2822_v18 = vadd.f32 %v2805_v62, %v1665_v31 }
 0x184   : > { %v1751_v24 = vadd.f32 %v1750_v33, %v1743_v7  ;;  %v1767_v5 = vmul.f32 %v1743_v7, %v2818_v4  ;;  %v1744_v35 = vmul.f32 %v1714_v50, %v2822_v18  ;;  %v1729_v33 = vpop.permute.xlu0 %1728 }
 0x185   : > { %v1640_v52 = vpop.f32.mrb[80].mxu0  ;;  %v1533_v53 = vpop.f32.mrb[80].mxu1 }
 0x186   : > { %v1775_v47 = vadd.f32 %v1774_v39, %v1767_v5  ;;  %v1752_v25 = vadd.f32 %v1751_v24, %v1744_v35  ;;  %v1768_v38 = vmul.f32 %v1744_v35, %v2822_v18  ;;  %v1666_v54 = vadd.f32 %v1640_v52, %v1551_v41  ;;  %v2270_v34 = vpop.f32.mrb[81].mxu0  ;;  %v2252_v16 = vpop.f32.mrb[81].mxu1 }
 0x187   : > { %v1553_v2 = vadd.f32 %v1533_v53, %v2796_v51  ;;  %v1643_v57 = vpop.f32.mrb[82].mxu0  ;;  %v1536_v59 = vpop.f32.mrb[82].mxu1 }
 0x188   : > { %v1776_v21 = vadd.f32 %v1775_v47, %v1768_v38  ;;  %v2829_v55 = vadd.f32 %v2805_v62, %v1666_v54  ;;  %v1667_v60 = vadd.f32 %v1643_v57, %v1552_v23  ;;  %v2271_v63 = vpop.f32.mrb[83].mxu0  ;;  %v1554_v6 = vadd.f32 %v1536_v59, %v2798_v48  ;;  %v2253_v8 = vpop.f32.mrb[83].mxu1 }
 0x189   : > { %v1739_v5 = vpop.permute.xlu0 %1738 }
 0x18a   : > { %v1745_v56 = vmul.f32 %v1719_v0, %v2829_v55  ;;  %v2834_v9 = vadd.f32 %v2805_v62, %v1667_v60 }
 0x18c   : > { %v1753_v51 = vadd.f32 %v1752_v25, %v1745_v56  ;;  %v1769_v11 = vmul.f32 %v1745_v56, %v2829_v55  ;;  %v1746_v12 = vmul.f32 %v1724_v10, %v2834_v9 }
 0x18d   : > { %v1648_v1 = vpop.f32.mrb[84].mxu0  ;;  %v1541_v14 = vpop.f32.mrb[84].mxu1 }
 0x18e   : > { %v1777_v61 = vadd.f32 %v1776_v21, %v1769_v11  ;;  %v1754_v13 = vadd.f32 %v1753_v51, %v1746_v12  ;;  %v1770_v49 = vmul.f32 %v1746_v12, %v2834_v9  ;;  %v1668_v15 = vadd.f32 %v1648_v1, %v1553_v2  ;;  %v2274_v48 = vpop.f32.mrb[85].mxu0  ;;  %v2256_v20 = vpop.f32.mrb[85].mxu1 }
 0x18f   : > { %v1555_v17 = vadd.f32 %v1541_v14, %v2800_v40  ;;  %v1651_v19 = vpop.f32.mrb[86].mxu0  ;;  %v1544_v32 = vpop.f32.mrb[86].mxu1 }
 0x190   : > { %v1778_v22 = vadd.f32 %v1777_v61, %v1770_v49  ;;  %v2841_v27 = vadd.f32 %v2805_v62, %v1668_v15  ;;  %v1669_v3 = vadd.f32 %v1651_v19, %v1554_v6  ;;  %v2275_v30 = vpop.f32.mrb[87].mxu0  ;;  %v2257_v36 = vpop.f32.mrb[87].mxu1 }
 0x192   : > { %v1747_v29 = vmul.f32 %v1729_v33, %v2841_v27  ;;  %v1685_v28 = vadd.f32 %v2805_v62, %v1669_v3 }
 0x194   : > { %v1755_v41 = vadd.f32 %v1754_v13, %v1747_v29  ;;  %v1771_v43 = vmul.f32 %v1747_v29, %v2841_v27  ;;  %v1748_v40 = vmul.f32 %v1734_v42, %v1685_v28 }
 0x195   : > { %v1656_v37 = vpop.f32.mrb[88].mxu0 }
 0x196   : > { %v1779_v39 = vadd.f32 %v1778_v22, %v1771_v43  ;;  %v1756_v46 = vadd.f32 %v1755_v41, %v1748_v40  ;;  %v1772_v31 = vmul.f32 %v1748_v40, %v1685_v28  ;;  %v1670_v44 = vadd.f32 %v1656_v37, %v1555_v17  ;;  %v2278_v23 = vpop.f32.mrb[89].mxu0 }
 0x197   : > { %v1659_v50 = vpop.f32.mrb[90].mxu0 }
 0x198   : > { %v1780_v45 = vadd.f32 %v1779_v39, %v1772_v31  ;;  %v1686_v7 = vadd.f32 %v2805_v62, %v1670_v44  ;;  %v2279_v24 = vpop.f32.mrb[91].mxu0 }
 0x19a   : > { %v1749_v35 = vmul.f32 %v1739_v5, %v1686_v7 }
 0x19c   : > { %v1757_v52 = vadd.f32 %v1756_v46, %v1749_v35  ;;  %v1773_v47 = vmul.f32 %v1749_v35, %v1686_v7 }
 0x19e   : > { %v1758_v25 = vrot.slane %v1757_v52, 4  ;;  %v1781_v38 = vadd.f32 %v1780_v45, %v1773_v47 }
 0x1a0   : > { %v1759_v53 = vadd.f32 %v1758_v25, %v1757_v52  ;;  %v1782_v54 = vrot.slane %v1781_v38, 4 }
 0x1a2   : > { %v1760_v34 = vrot.slane %v1759_v53, 2  ;;  %v1783_v2 = vadd.f32 %v1782_v54, %v1781_v38 }
 0x1a4   : > { %v1761_v16 = vadd.f32 %v1760_v34, %v1759_v53  ;;  %v1784_v57 = vrot.slane %v1783_v2, 2 }
 0x1a6   : > { %v1762_v21 = vrot.slane %v1761_v16, 1  ;;  %v1785_v59 = vadd.f32 %v1784_v57, %v1783_v2 }
 0x1a8   : > { %v1763_v60 = vadd.f32 %v1762_v21, %v1761_v16  ;;  %v1786_v63 = vrot.slane %v1785_v59, 1 }
 0x1aa   : > { %v1764_v0 = vmul.f32 0.015625, %v1763_v60  ;;  %v1787_v6 = vadd.f32 %v1786_v63, %v1785_v59 }
 0x1ac   : > { %v1788_v62 = vmul.f32 0.015625, %v1787_v6  ;;  %v1789_v8 = vmul.f32 %v1764_v0, %v1764_v0  ;;  %v1794_v56 = vsub.f32 %v2808_v58, %v1764_v0  ;;  %v1795_v10 = vsub.f32 %v2812_v26, %v1764_v0 }
 0x1ad   : > { %v1796_v51 = vsub.f32 %v2818_v4, %v1764_v0  ;;  %v1797_v11 = vsub.f32 %v2822_v18, %v1764_v0  ;;  %v1798_v12 = vsub.f32 %v2829_v55, %v1764_v0  ;;  %v1799_v1 = vsub.f32 %v2834_v9, %v1764_v0 }
 0x1ae   : > { %v1790_v61 = vsub.f32 %v1788_v62, %v1789_v8  ;;  %v1800_v13 = vsub.f32 %v2841_v27, %v1764_v0  ;;  %v1801_v49 = vsub.f32 %v1685_v28, %v1764_v0  ;;  %v1802_v14 = vsub.f32 %v1686_v7, %v1764_v0 }
 0x1b0   : > { %v1791_v15 = vmax.f32 %v1790_v61, 0.0 }
 0x1b2   : > { %v1792_v48 = vadd.f32 1e-05, %v1791_v15 }
 0x1b4   : > { %2338 = vrsqrt.f32 %v1792_v48 }
 0x1be   : > { %v2339_v58 = vpop.eup %2338 }
 0x1bf   : > { %v1803_v17 = vmul.f32 %v2339_v58, %v1794_v56  ;;  %v1804_v26 = vmul.f32 %v2339_v58, %v1795_v10  ;;  %v1805_v19 = vmul.f32 %v2339_v58, %v1796_v51  ;;  %v1806_v4 = vmul.f32 %v2339_v58, %v1797_v11 }
 0x1c0   : > { %v1807_v18 = vmul.f32 %v2339_v58, %v1798_v12  ;;  %v1808_v55 = vmul.f32 %v2339_v58, %v1799_v1  ;;  %v1809_v9 = vmul.f32 %v2339_v58, %v1800_v13  ;;  %v1810_v20 = vmul.f32 %v2339_v58, %v1801_v49 }
 0x1c1   : > { %v1811_v22 = vmul.f32 %v2339_v58, %v1802_v14  ;;  %v1812_v27 = vmax.f32 %v1803_v17, 0.0  ;;  %v1813_v3 = vmax.f32 %v1804_v26, 0.0  ;;  %v1814_v30 = vmax.f32 %v1805_v19, 0.0 }
 0x1c2   : > { %v1815_v32 = vmax.f32 %v1806_v4, 0.0  ;;  %v1816_v33 = vmax.f32 %v1807_v18, 0.0  ;;  %v1817_v36 = vmax.f32 %v1808_v55, 0.0  ;;  %v1818_v29 = vmax.f32 %v1809_v9, 0.0 }
 0x1c3   : > { %v1819_v28 = vmax.f32 %v1810_v20, 0.0  ;;  %v1820_v42 = vmax.f32 %v1811_v22, 0.0  ;;  %1821 = vst [vmem:[%s338_s16] sm:$0xff] %v1812_v27  ;;  %1822 = vst [vmem:[%s338_s16 + $0x8] sm:$0xff] %v1813_v3 }
 0x1c4   : > { %1823 = vst [vmem:[%s338_s16 + $0x10] sm:$0xff] %v1814_v30  ;;  %1824 = vst [vmem:[%s338_s16 + $0x18] sm:$0xff] %v1815_v32 }
 0x1c5   : > { %1825 = vst [vmem:[%s338_s16 + $0x20] sm:$0xff] %v1816_v33  ;;  %1826 = vst [vmem:[%s338_s16 + $0x28] sm:$0xff] %v1817_v36 }
 0x1c6   : > { %1827 = vst [vmem:[%s338_s16 + $0x30] sm:$0xff] %v1818_v29  ;;  %1828 = vst [vmem:[%s338_s16 + $0x38] sm:$0xff] %v1819_v28 }
 0x1c7   : > { %1829 = vst [vmem:[%s338_s16 + $0x40] sm:$0xff] %v1820_v42 }
 0x1c8 PF: > { %s17_s24 = sadd.s32 1, %s2346_s24  }
 0x1c9   : > { %p14_p4 = scmp.ge.s32.totalorder %s17_s24, 4  }
 0x1cb   :  { %16 = sbr.rel (!%p14_p4) target bundleno = 1 (0x1), region = 95 }

</bundles_post_ra>
